<compile_context>
chip_gen: v6e
topology: v6e:2x2x1
jax: 0.10.0
libtpu: 0.0.40
codegen_flags: <defaults>
</compile_context>

<pallas_src>
import jax
import jax.numpy as jnp
from jax.experimental import pallas as pl
from jax.experimental.pallas import tpu as pltpu


# ----------------------------- Pallas kernel --------------------------------
def _basic_block_kernel(x_ref, b1_ref, sh1_ref, b2_ref, sh2_ref, o_ref, xp_ref):
    """Fused BasicBlock for one batch element, lane-dense (H, W*C) layout.

    x_ref   : (H, W*C)          input activation == residual (read once)
    b1_ref  : (3, W*C, W*C)     banded conv1 weights, BN1 scale folded in
    sh1_ref : (1, W*C)          BN1 shift, tiled per output pixel
    b2_ref  : (3, W*C, W*C)     banded conv2 weights, BN2 scale folded in
    sh2_ref : (1, W*C)          BN2 shift, tiled per output pixel
    o_ref   : (H, W*C)          output
    xp_ref  : (H+2, W*C) f32    VMEM scratch: height-padded activation
    """
    H, WC = o_ref.shape
    KH = b1_ref.shape[0]  # 3

    x2 = x_ref[...].astype(jnp.float32)

    # Zero the scratch once per step: rows 0 and H+1 are the SAME padding rows
    # in the height direction (width padding is implicit in the banded weights).
    xp_ref[...] = jnp.zeros_like(xp_ref)

    def conv_banded(b_ref, sh_ref):
        xp = xp_ref[...]                                  # (H+2, W*C)
        acc = jnp.zeros((H, WC), jnp.float32)
        for ky in range(KH):                              # unrolled: 3 MXU dots
            acc = acc + jnp.dot(xp[ky:ky + H, :], b_ref[ky],
                                preferred_element_type=jnp.float32)
        return acc + sh_ref[...]                          # BN shift (bias)

    # ---- conv1 + bn1 + relu ----
    xp_ref[pl.ds(1, H), :] = x2
    h1 = jnp.maximum(conv_banded(b1_ref, sh1_ref), 0.0)

    # ---- conv2 + bn2 + residual + relu (h1 never leaves VMEM) ----
    xp_ref[pl.ds(1, H), :] = h1                           # border rows stay zero
    out = jnp.maximum(conv_banded(b2_ref, sh2_ref) + x2, 0.0)
    o_ref[...] = out.astype(o_ref.dtype)


def _fused_basic_block(x2d, b1, sh1, b2, sh2):
    """x2d: (N, H, W*C); b*: (3, W*C, W*C); sh*: (1, W*C)."""
    N, H, WC = x2d.shape
    return pl.pallas_call(
        _basic_block_kernel,
        out_shape=jax.ShapeDtypeStruct((N, H, WC), x2d.dtype),
        grid_spec=pltpu.PrefetchScalarGridSpec(
            num_scalar_prefetch=0,
            grid=(N,),
            in_specs=[
                pl.BlockSpec((pl.Squeezed(), H, WC), lambda n: (n, 0, 0)),
                pl.BlockSpec(b1.shape, lambda n: (0, 0, 0)),
                pl.BlockSpec((1, WC), lambda n: (0, 0)),
                pl.BlockSpec(b2.shape, lambda n: (0, 0, 0)),
                pl.BlockSpec((1, WC), lambda n: (0, 0)),
            ],
            out_specs=pl.BlockSpec((pl.Squeezed(), H, WC), lambda n: (n, 0, 0)),
            scratch_shapes=[pltpu.VMEM((H + 2, WC), jnp.float32)],
        ),
        compiler_params=pltpu.CompilerParams(
            dimension_semantics=("parallel",)),
    )(x2d, b1, sh1, b2, sh2)


# ------------------------- plain-JAX wrapper glue ----------------------------
def fold_bn(gamma, beta, mean, var, eps=1e-5):
    scale = gamma / jnp.sqrt(var + eps)
    shift = beta - mean * scale
    return scale, shift


def _build_banded_weights(w_hwio, width):
    """(3,3,Cin,Cout) HWIO kernel -> (3, width*Cin, width*Cout) banded matrices.

    B[ky][s*Cin+ci, w*Cout+co] = w[ky, s-w+1, ci, co] when 0 <= s-w+1 < 3 else 0,
    so  out2d[h] = sum_ky  xpad2d[h+ky] @ B[ky]  is the stride-1 SAME 3x3 conv
    in the lane-dense (row, width*channel) layout; width zero-padding is
    implicit in the band, height padding is done by the kernel's scratch.
    """
    kh, kw, cin, cout = w_hwio.shape
    mats = []
    for ky in range(kh):
        b = jnp.zeros((width * cin, width * cout), jnp.float32)
        for kx in range(kw):
            sel = jnp.eye(width, width, k=1 - kx, dtype=jnp.float32)
            b = b + jnp.kron(sel, w_hwio[ky, kx].astype(jnp.float32))
        mats.append(b)
    return jnp.stack(mats)  # (3, width*Cin, width*Cout)


def basic_block_forward(x_nchw, params):
    """BasicBlock forward. Input/output are NCHW to match PyTorch.

    NOTE: the NCHW<->NHWC transposes are boundary-only plumbing; they vanish if
    the surrounding model keeps activations in the lane-dense (N, H, W*C) form.
    """
    N, C, H, W = x_nchw.shape
    x2d = jnp.transpose(x_nchw, (0, 2, 3, 1)).reshape(N, H, W * C)

    s1, sh1 = fold_bn(params["bn1_g"], params["bn1_b"],
                      params["bn1_m"], params["bn1_v"])
    s2, sh2 = fold_bn(params["bn2_g"], params["bn2_b"],
                      params["bn2_m"], params["bn2_v"])

    # Fold BN scale into the conv weights; keep only the shift as a bias.
    w1 = params["w1"] * s1[None, None, None, :]
    w2 = params["w2"] * s2[None, None, None, :]
    b1 = _build_banded_weights(w1, W)
    b2 = _build_banded_weights(w2, W)
    sh1t = jnp.tile(sh1.astype(jnp.float32), W).reshape(1, W * C)
    sh2t = jnp.tile(sh2.astype(jnp.float32), W).reshape(1, W * C)

    out2d = _fused_basic_block(x2d, b1, sh1t, b2, sh2t)
    return jnp.transpose(out2d.reshape(N, H, W, C), (0, 3, 1, 2))


# ------------------------- pure-JAX reference --------------------------------
def _ref_forward(x_nchw, params):
    x = jnp.transpose(x_nchw, (0, 2, 3, 1))

    def conv(a, w):
        return jax.lax.conv_general_dilated(
            a, w, window_strides=(1, 1), padding="SAME",
            dimension_numbers=("NHWC", "HWIO", "NHWC"))

    s1, sh1 = fold_bn(params["bn1_g"], params["bn1_b"],
                      params["bn1_m"], params["bn1_v"])
    s2, sh2 = fold_bn(params["bn2_g"], params["bn2_b"],
                      params["bn2_m"], params["bn2_v"])
    out = jnp.maximum(conv(x, params["w1"]) * s1 + sh1, 0.0)
    out = jnp.maximum(conv(out, params["w2"]) * s2 + sh2 + x, 0.0)
    return jnp.transpose(out, (0, 3, 1, 2))


if __name__ == "__main__":
    N, C, H, W = 2, 8, 16, 16  # inplanes == planes (identity residual); W*C = 128
    key = jax.random.PRNGKey(0)
    keys = jax.random.split(key, 7)

    x = jax.random.normal(keys[0], (N, C, H, W), dtype=jnp.float32)

    # Conv weights in HWIO; BN params per-channel (inference / running stats).
    params = {
        "w1": 0.1 * jax.random.normal(keys[1], (3, 3, C, C), dtype=jnp.float32),
        "w2": 0.1 * jax.random.normal(keys[2], (3, 3, C, C), dtype=jnp.float32),
        "bn1_g": 1.0 + 0.05 * jnp.arange(C, dtype=jnp.float32),
        "bn1_b": 0.02 * jnp.arange(C, dtype=jnp.float32),
        "bn1_m": 0.1 * jax.random.normal(keys[3], (C,), dtype=jnp.float32),
        "bn1_v": 1.0 + 0.1 * jnp.abs(jax.random.normal(keys[4], (C,), dtype=jnp.float32)),
        "bn2_g": 1.0 - 0.03 * jnp.arange(C, dtype=jnp.float32),
        "bn2_b": -0.01 * jnp.arange(C, dtype=jnp.float32),
        "bn2_m": 0.1 * jax.random.normal(keys[5], (C,), dtype=jnp.float32),
        "bn2_v": 1.0 + 0.1 * jnp.abs(jax.random.normal(keys[6], (C,), dtype=jnp.float32)),
    }

    fwd = jax.jit(basic_block_forward)
    out = jax.block_until_ready(fwd(x, params))
    ref = jax.block_until_ready(_ref_forward(x, params))

    assert out.shape == (N, C, H, W)
    max_err = float(jnp.max(jnp.abs(out - ref)))
    assert jnp.allclose(out, ref, atol=1e-4, rtol=1e-4), max_err
    print("KERNEL_OK")
</pallas_src>

<mosaic_0001>
module attributes {stable_mosaic.version = 11 : i64} {
  func.func @_basic_block_kernel(%arg0: i32, %arg1: memref<1x16x128xf32, #tpu.memory_space<vmem>>, %arg2: memref<3x128x128xf32, #tpu.memory_space<vmem>>, %arg3: memref<1x128xf32, #tpu.memory_space<vmem>>, %arg4: memref<3x128x128xf32, #tpu.memory_space<vmem>>, %arg5: memref<1x128xf32, #tpu.memory_space<vmem>>, %arg6: memref<1x16x128xf32, #tpu.memory_space<vmem>>, %arg7: memref<18x128xf32, #tpu.memory_space<vmem>>) attributes {dimension_semantics = [#tpu.dimension_semantics<parallel>], iteration_bounds = array<i64: 2>, scalar_prefetch = 0 : i64, scratch_operands = 1 : i64, tpu.core_type = #tpu.core_type<tc>, window_params = [{transform_indices = @transform_0, window_bounds = array<i64: 1, 16, 128>}, {pipeline_mode = #tpu.pipeline_mode<synchronous>, transform_indices = @transform_1, window_bounds = array<i64: 3, 128, 128>}, {pipeline_mode = #tpu.pipeline_mode<synchronous>, transform_indices = @transform_2, window_bounds = array<i64: 1, 128>}, {pipeline_mode = #tpu.pipeline_mode<synchronous>, transform_indices = @transform_3, window_bounds = array<i64: 3, 128, 128>}, {pipeline_mode = #tpu.pipeline_mode<synchronous>, transform_indices = @transform_4, window_bounds = array<i64: 1, 128>}, {transform_indices = @transform_5, window_bounds = array<i64: 1, 16, 128>}]} {
    %c0 = arith.constant 0 : index
    %c0_0 = arith.constant 0 : index
    %c0_1 = arith.constant 0 : index
    %0 = vector.load %arg1[%c0, %c0_0, %c0_1] : memref<1x16x128xf32, #tpu.memory_space<vmem>>, vector<1x16x128xf32>
    %1 = vector.shape_cast %0 : vector<1x16x128xf32> to vector<16x128xf32>
    %cst = arith.constant 0.000000e+00 : f32
    %2 = vector.broadcast %cst : f32 to vector<18x128xf32>
    %c0_2 = arith.constant 0 : index
    %c0_3 = arith.constant 0 : index
    %3 = vector.load %arg7[%c0_2, %c0_3] : memref<18x128xf32, #tpu.memory_space<vmem>>, vector<18x128xf32>
    tpu.vector_store %arg7[%c0_2, %c0_3], %2 {strides = array<i32>} : memref<18x128xf32, #tpu.memory_space<vmem>>, vector<18x128xf32>,
    %c1 = arith.constant 1 : index
    %c0_4 = arith.constant 0 : index
    %4 = vector.load %arg7[%c1, %c0_4] : memref<18x128xf32, #tpu.memory_space<vmem>>, vector<16x128xf32>
    tpu.vector_store %arg7[%c1, %c0_4], %1 {strides = array<i32>} : memref<18x128xf32, #tpu.memory_space<vmem>>, vector<16x128xf32>,
    %c0_5 = arith.constant 0 : index
    %c0_6 = arith.constant 0 : index
    %5 = vector.load %arg7[%c0_5, %c0_6] : memref<18x128xf32, #tpu.memory_space<vmem>>, vector<18x128xf32>
    %cst_7 = arith.constant 0.000000e+00 : f32
    %6 = vector.broadcast %cst_7 : f32 to vector<16x128xf32>
    %7 = vector.extract_strided_slice %5 {offsets = [0, 0], sizes = [16, 128], strides = [1, 1]} : vector<18x128xf32> to vector<16x128xf32>
    %c0_8 = arith.constant 0 : index
    %c0_9 = arith.constant 0 : index
    %c0_10 = arith.constant 0 : index
    %8 = vector.load %arg2[%c0_8, %c0_9, %c0_10] : memref<3x128x128xf32, #tpu.memory_space<vmem>>, vector<1x128x128xf32>
    %9 = vector.shape_cast %8 : vector<1x128x128xf32> to vector<128x128xf32>
    %cst_11 = arith.constant dense<0.000000e+00> : vector<16x128xf32>
    %10 = tpu.matmul %7, %9, %cst_11 {dimension_numbers = #tpu.dot_dimension_numbers<[1], [0], [0], [1], [0, 0, 1, 1], [], []>} : vector<16x128xf32>, vector<128x128xf32>, vector<16x128xf32> -> vector<16x128xf32>
    %11 = arith.addf %6, %10 : vector<16x128xf32>
    %12 = vector.extract_strided_slice %5 {offsets = [1, 0], sizes = [16, 128], strides = [1, 1]} : vector<18x128xf32> to vector<16x128xf32>
    %c1_12 = arith.constant 1 : index
    %c0_13 = arith.constant 0 : index
    %c0_14 = arith.constant 0 : index
    %13 = vector.load %arg2[%c1_12, %c0_13, %c0_14] : memref<3x128x128xf32, #tpu.memory_space<vmem>>, vector<1x128x128xf32>
    %14 = vector.shape_cast %13 : vector<1x128x128xf32> to vector<128x128xf32>
    %cst_15 = arith.constant dense<0.000000e+00> : vector<16x128xf32>
    %15 = tpu.matmul %12, %14, %cst_15 {dimension_numbers = #tpu.dot_dimension_numbers<[1], [0], [0], [1], [0, 0, 1, 1], [], []>} : vector<16x128xf32>, vector<128x128xf32>, vector<16x128xf32> -> vector<16x128xf32>
    %16 = arith.addf %11, %15 : vector<16x128xf32>
    %17 = vector.extract_strided_slice %5 {offsets = [2, 0], sizes = [16, 128], strides = [1, 1]} : vector<18x128xf32> to vector<16x128xf32>
    %c2 = arith.constant 2 : index
    %c0_16 = arith.constant 0 : index
    %c0_17 = arith.constant 0 : index
    %18 = vector.load %arg2[%c2, %c0_16, %c0_17] : memref<3x128x128xf32, #tpu.memory_space<vmem>>, vector<1x128x128xf32>
    %19 = vector.shape_cast %18 : vector<1x128x128xf32> to vector<128x128xf32>
    %cst_18 = arith.constant dense<0.000000e+00> : vector<16x128xf32>
    %20 = tpu.matmul %17, %19, %cst_18 {dimension_numbers = #tpu.dot_dimension_numbers<[1], [0], [0], [1], [0, 0, 1, 1], [], []>} : vector<16x128xf32>, vector<128x128xf32>, vector<16x128xf32> -> vector<16x128xf32>
    %21 = arith.addf %16, %20 : vector<16x128xf32>
    %c0_19 = arith.constant 0 : index
    %c0_20 = arith.constant 0 : index
    %22 = vector.load %arg3[%c0_19, %c0_20] : memref<1x128xf32, #tpu.memory_space<vmem>>, vector<1x128xf32>
    %23 = vector.broadcast %22 : vector<1x128xf32> to vector<16x128xf32>
    %24 = arith.addf %21, %23 : vector<16x128xf32>
    %cst_21 = arith.constant 0.000000e+00 : f32
    %25 = vector.broadcast %cst_21 : f32 to vector<16x128xf32>
    %26 = arith.maximumf %24, %25 : vector<16x128xf32>
    %c1_22 = arith.constant 1 : index
    %c0_23 = arith.constant 0 : index
    %27 = vector.load %arg7[%c1_22, %c0_23] : memref<18x128xf32, #tpu.memory_space<vmem>>, vector<16x128xf32>
    tpu.vector_store %arg7[%c1_22, %c0_23], %26 {strides = array<i32>} : memref<18x128xf32, #tpu.memory_space<vmem>>, vector<16x128xf32>,
    %c0_24 = arith.constant 0 : index
    %c0_25 = arith.constant 0 : index
    %28 = vector.load %arg7[%c0_24, %c0_25] : memref<18x128xf32, #tpu.memory_space<vmem>>, vector<18x128xf32>
    %cst_26 = arith.constant 0.000000e+00 : f32
    %29 = vector.broadcast %cst_26 : f32 to vector<16x128xf32>
    %30 = vector.extract_strided_slice %28 {offsets = [0, 0], sizes = [16, 128], strides = [1, 1]} : vector<18x128xf32> to vector<16x128xf32>
    %c0_27 = arith.constant 0 : index
    %c0_28 = arith.constant 0 : index
    %c0_29 = arith.constant 0 : index
    %31 = vector.load %arg4[%c0_27, %c0_28, %c0_29] : memref<3x128x128xf32, #tpu.memory_space<vmem>>, vector<1x128x128xf32>
    %32 = vector.shape_cast %31 : vector<1x128x128xf32> to vector<128x128xf32>
    %cst_30 = arith.constant dense<0.000000e+00> : vector<16x128xf32>
    %33 = tpu.matmul %30, %32, %cst_30 {dimension_numbers = #tpu.dot_dimension_numbers<[1], [0], [0], [1], [0, 0, 1, 1], [], []>} : vector<16x128xf32>, vector<128x128xf32>, vector<16x128xf32> -> vector<16x128xf32>
    %34 = arith.addf %29, %33 : vector<16x128xf32>
    %35 = vector.extract_strided_slice %28 {offsets = [1, 0], sizes = [16, 128], strides = [1, 1]} : vector<18x128xf32> to vector<16x128xf32>
    %c1_31 = arith.constant 1 : index
    %c0_32 = arith.constant 0 : index
    %c0_33 = arith.constant 0 : index
    %36 = vector.load %arg4[%c1_31, %c0_32, %c0_33] : memref<3x128x128xf32, #tpu.memory_space<vmem>>, vector<1x128x128xf32>
    %37 = vector.shape_cast %36 : vector<1x128x128xf32> to vector<128x128xf32>
    %cst_34 = arith.constant dense<0.000000e+00> : vector<16x128xf32>
    %38 = tpu.matmul %35, %37, %cst_34 {dimension_numbers = #tpu.dot_dimension_numbers<[1], [0], [0], [1], [0, 0, 1, 1], [], []>} : vector<16x128xf32>, vector<128x128xf32>, vector<16x128xf32> -> vector<16x128xf32>
    %39 = arith.addf %34, %38 : vector<16x128xf32>
    %40 = vector.extract_strided_slice %28 {offsets = [2, 0], sizes = [16, 128], strides = [1, 1]} : vector<18x128xf32> to vector<16x128xf32>
    %c2_35 = arith.constant 2 : index
    %c0_36 = arith.constant 0 : index
    %c0_37 = arith.constant 0 : index
    %41 = vector.load %arg4[%c2_35, %c0_36, %c0_37] : memref<3x128x128xf32, #tpu.memory_space<vmem>>, vector<1x128x128xf32>
    %42 = vector.shape_cast %41 : vector<1x128x128xf32> to vector<128x128xf32>
    %cst_38 = arith.constant dense<0.000000e+00> : vector<16x128xf32>
    %43 = tpu.matmul %40, %42, %cst_38 {dimension_numbers = #tpu.dot_dimension_numbers<[1], [0], [0], [1], [0, 0, 1, 1], [], []>} : vector<16x128xf32>, vector<128x128xf32>, vector<16x128xf32> -> vector<16x128xf32>
    %44 = arith.addf %39, %43 : vector<16x128xf32>
    %c0_39 = arith.constant 0 : index
    %c0_40 = arith.constant 0 : index
    %45 = vector.load %arg5[%c0_39, %c0_40] : memref<1x128xf32, #tpu.memory_space<vmem>>, vector<1x128xf32>
    %46 = vector.broadcast %45 : vector<1x128xf32> to vector<16x128xf32>
    %47 = arith.addf %44, %46 : vector<16x128xf32>
    %48 = arith.addf %47, %1 : vector<16x128xf32>
    %cst_41 = arith.constant 0.000000e+00 : f32
    %49 = vector.broadcast %cst_41 : f32 to vector<16x128xf32>
    %50 = arith.maximumf %48, %49 : vector<16x128xf32>
    %c0_42 = arith.constant 0 : index
    %c0_43 = arith.constant 0 : index
    %c0_44 = arith.constant 0 : index
    %51 = vector.load %arg6[%c0_42, %c0_43, %c0_44] : memref<1x16x128xf32, #tpu.memory_space<vmem>>, vector<1x16x128xf32>
    %52 = vector.shape_cast %51 : vector<1x16x128xf32> to vector<16x128xf32>
    %53 = vector.shape_cast %50 : vector<16x128xf32> to vector<1x16x128xf32>
    tpu.vector_store %arg6[%c0_42, %c0_43, %c0_44], %53 {strides = array<i32>} : memref<1x16x128xf32, #tpu.memory_space<vmem>>, vector<1x16x128xf32>,
    return
  }
  func.func @transform_0(%arg0: i32) -> (i32, i32, i32) {
    %c0_i32 = arith.constant 0 : i32
    %c0_i32_0 = arith.constant 0 : i32
    %c0_i32_1 = arith.constant 0 : i32
    return %arg0, %c0_i32, %c0_i32_0 : i32, i32, i32
  }
  func.func @transform_1(%arg0: i32) -> (i32, i32, i32) {
    %c0_i32 = arith.constant 0 : i32
    %c0_i32_0 = arith.constant 0 : i32
    %c0_i32_1 = arith.constant 0 : i32
    %c0_i32_2 = arith.constant 0 : i32
    return %c0_i32, %c0_i32_0, %c0_i32_1 : i32, i32, i32
  }
  func.func @transform_2(%arg0: i32) -> (i32, i32) {
    %c0_i32 = arith.constant 0 : i32
    %c0_i32_0 = arith.constant 0 : i32
    %c0_i32_1 = arith.constant 0 : i32
    return %c0_i32, %c0_i32_0 : i32, i32
  }
  func.func @transform_3(%arg0: i32) -> (i32, i32, i32) {
    %c0_i32 = arith.constant 0 : i32
    %c0_i32_0 = arith.constant 0 : i32
    %c0_i32_1 = arith.constant 0 : i32
    %c0_i32_2 = arith.constant 0 : i32
    return %c0_i32, %c0_i32_0, %c0_i32_1 : i32, i32, i32
  }
  func.func @transform_4(%arg0: i32) -> (i32, i32) {
    %c0_i32 = arith.constant 0 : i32
    %c0_i32_0 = arith.constant 0 : i32
    %c0_i32_1 = arith.constant 0 : i32
    return %c0_i32, %c0_i32_0 : i32, i32
  }
  func.func @transform_5(%arg0: i32) -> (i32, i32, i32) {
    %c0_i32 = arith.constant 0 : i32
    %c0_i32_0 = arith.constant 0 : i32
    %c0_i32_1 = arith.constant 0 : i32
    return %arg0, %c0_i32, %c0_i32_0 : i32, i32, i32
  }
}

</mosaic_0001>

<bundles_post_ra>
// kernel: tile.13
= control target key start
LH: loop header
LB: loop body
LE: loop exit
PB: predicated region body
PF: predicated region fallthrough
CT: control target
= control target key end

     0   :  { %s28_s0 = inlined_call_operand.vmem [shape: f32[8], index: 0, kind: input, shape index: {}]   ;;  %s29_s1 = inlined_call_operand.vmem [shape: f32[16,8], index: 1, kind: output, shape index: {}]  }
   0x1   :  { %v4_v0 = vld [vmem:[%s28_s0] ss:$0 sm:$0xff] }
   0x2   :  { %5 = vst [vmem:[%s29_s1] sm:$0xff] %v4_v0  ;;  %8 = vst [vmem:[%s29_s1 + $0x8] sm:$0xff] %v4_v0 }

// kernel: tile.14
= control target key start
LH: loop header
LB: loop body
LE: loop exit
PB: predicated region body
PF: predicated region fallthrough
CT: control target
= control target key end

     0   :  { %s133_s10 = smov 120   ;;  %s134_s11 = smov 104   ;;  %vm3_vm0 = vcmask 64512   ;;  %vm9_vm1 = vcmask 1048512   ;;  %vm15_vm2 = vcmask 982912   ;;  %vm21_vm3 = vcmask 917312   ;;  %s209_s0 = inlined_call_operand.vmem [shape: f32[16,8], index: 0, kind: input, shape index: {}]   ;;  %s210_s1 = inlined_call_operand.vmem [shape: f32[1,128], index: 1, kind: output, shape index: {}]  }
   0x1   :  { %v103_v0 = vld [vmem:[%s209_s0 + $0xf] sm:$0x1]   ;;  %v105_v1 = vld [vmem:[%s209_s0 + $0xd] sm:$0x1]   ;;  %v104_v2 = vld [vmem:[%s209_s0 + $0xe] sm:$0x1]  }
   0x2   :  { %7 = vrot.lane.b32.xlu0 %v103_v0, %s133_s10  ;;  %19 = vrot.lane.b32.xlu1 %v105_v1, %s134_s11  ;;  %v106_v3 = vld [vmem:[%s209_s0 + $0xc] sm:$0x1]   ;;  %s135_s16 = smov 112   ;;  %s136_s17 = smov 96   ;;  %v107_v4 = vld [vmem:[%s209_s0 + $0xb] sm:$0x1]  }
   0x3   :  { %v108_v5 = vld [vmem:[%s209_s0 + $0xa] sm:$0x1]   ;;  %v2_v6 = vld [vmem:[%s209_s0] sm:$0x1]   ;;  %s137_s24 = smov 88   ;;  %s138_s25 = smov 80  }
   0x4   :  { %4 = vst.msk [vmem:[#allocation0] sm:$0x1] %vm3_vm0, %v2_v6   ;;  %v109_v7 = vld [vmem:[%s209_s0 + $0x9] sm:$0x1]   ;;  %v110_v8 = vld [vmem:[%s209_s0 + $0x8] sm:$0x1]  }
   0x5   :  { %s139_s30 = smov 72   ;;  %s140_s2 = smov 64   ;;  %v111_v9 = vld [vmem:[%s209_s0 + $0x7] sm:$0x1]   ;;  %v112_v10 = vld [vmem:[%s209_s0 + $0x6] sm:$0x1]  }
   0x6   :  { %13 = vrot.lane.b32.xlu0 %v104_v2, %s135_s16  ;;  %25 = vrot.lane.b32.xlu1 %v106_v3, %s136_s17  ;;  %s141_s7 = smov 56   ;;  %s142_s8 = smov 48   ;;  %v113_v11 = vld [vmem:[%s209_s0 + $0x5] sm:$0x1]   ;;  %v114_v12 = vld [vmem:[%s209_s0 + $0x4] sm:$0x1]  }
   0x7   :  { %s143_s13 = smov 40   ;;  %s144_s14 = smov 32   ;;  %v115_v13 = vld [vmem:[%s209_s0 + $0x3] sm:$0x1]   ;;  %v116_v14 = vld [vmem:[%s209_s0 + $0x2] sm:$0x1]  }
   0x8   :  { %s145_s19 = smov 24   ;;  %s146_s20 = smov 16   ;;  %v117_v15 = vld [vmem:[%s209_s0 + $0x1] sm:$0x1]   ;;  %vm27_vm4 = vcmask 851712   ;;  %vm33_vm5 = vcmask 786112  }
   0x9   :  { %s147_s0 = smov 8   ;;  %vm39_vm6 = vcmask 720512   ;;  %vm45_vm7 = vcmask 654912   ;;  %vm51_vm8 = vcmask 589312   ;;  %vm57_vm9 = vcmask 523712  }
   0xa   :  { %31 = vrot.lane.b32.xlu0 %v107_v4, %s137_s24  ;;  %37 = vrot.lane.b32.xlu1 %v108_v5, %s138_s25  ;;  %vm63_vm10 = vcmask 458112   ;;  %vm69_vm11 = vcmask 392512   ;;  %vm75_vm12 = vcmask 326912   ;;  %vm81_vm13 = vcmask 261312  }
   0xb   :  { %vm87_vm14 = vcmask 195712   ;;  %vm93_vm15 = vcmask 130112  }
   0xe   :  { %43 = vrot.lane.b32.xlu0 %v109_v7, %s139_s30  ;;  %49 = vrot.lane.b32.xlu1 %v110_v8, %s140_s2 }
  0x12   :  { %55 = vrot.lane.b32.xlu0 %v111_v9, %s141_s7  ;;  %61 = vrot.lane.b32.xlu1 %v112_v10, %s142_s8 }
  0x16   :  { %67 = vrot.lane.b32.xlu0 %v113_v11, %s143_s13  ;;  %73 = vrot.lane.b32.xlu1 %v114_v12, %s144_s14 }
  0x1a   :  { %79 = vrot.lane.b32.xlu0 %v115_v13, %s145_s19  ;;  %85 = vrot.lane.b32.xlu1 %v116_v14, %s146_s20 }
  0x1e   :  { %91 = vrot.lane.b32.xlu0 %v117_v15, %s147_s0 }
  0x74   :  { %v8_v16 = vpop.permute.xlu0 %7   ;;  %v20_v17 = vpop.permute.xlu1 %19  }
  0x75   :  { %10 = vst.msk [vmem:[#allocation0] sm:$0x1] %vm9_vm1, %v8_v16  }
  0x78   :  { %v14_v18 = vpop.permute.xlu0 %13   ;;  %v26_v19 = vpop.permute.xlu1 %25  }
  0x79   :  { %16 = vst.msk [vmem:[#allocation0] sm:$0x1] %vm15_vm2, %v14_v18  }
  0x7a   :  { %22 = vst.msk [vmem:[#allocation0] sm:$0x1] %vm21_vm3, %v20_v17  }
  0x7b   :  { %28 = vst.msk [vmem:[#allocation0] sm:$0x1] %vm27_vm4, %v26_v19  }
  0x7c   :  { %v32_v20 = vpop.permute.xlu0 %31   ;;  %v38_v21 = vpop.permute.xlu1 %37  }
  0x7d   :  { %34 = vst.msk [vmem:[#allocation0] sm:$0x1] %vm33_vm5, %v32_v20  }
  0x7e   :  { %40 = vst.msk [vmem:[#allocation0] sm:$0x1] %vm39_vm6, %v38_v21  }
  0x80   :  { %v44_v22 = vpop.permute.xlu0 %43   ;;  %v50_v23 = vpop.permute.xlu1 %49  }
  0x81   :  { %46 = vst.msk [vmem:[#allocation0] sm:$0x1] %vm45_vm7, %v44_v22  }
  0x82   :  { %52 = vst.msk [vmem:[#allocation0] sm:$0x1] %vm51_vm8, %v50_v23  }
  0x84   :  { %v56_v24 = vpop.permute.xlu0 %55   ;;  %v62_v25 = vpop.permute.xlu1 %61  }
  0x85   :  { %58 = vst.msk [vmem:[#allocation0] sm:$0x1] %vm57_vm9, %v56_v24  }
  0x86   :  { %64 = vst.msk [vmem:[#allocation0] sm:$0x1] %vm63_vm10, %v62_v25  }
  0x88   :  { %v68_v26 = vpop.permute.xlu0 %67   ;;  %v74_v27 = vpop.permute.xlu1 %73  }
  0x89   :  { %70 = vst.msk [vmem:[#allocation0] sm:$0x1] %vm69_vm11, %v68_v26  }
  0x8a   :  { %76 = vst.msk [vmem:[#allocation0] sm:$0x1] %vm75_vm12, %v74_v27  }
  0x8c   :  { %v80_v28 = vpop.permute.xlu0 %79   ;;  %v86_v29 = vpop.permute.xlu1 %85  }
  0x8d   :  { %82 = vst.msk [vmem:[#allocation0] sm:$0x1] %vm81_vm13, %v80_v28  }
  0x8e   :  { %88 = vst.msk [vmem:[#allocation0] sm:$0x1] %vm87_vm14, %v86_v29  }
  0x90   :  { %v92_v30 = vpop.permute.xlu0 %91  }
  0x91   :  { %94 = vst.msk [vmem:[#allocation0] sm:$0x1] %vm93_vm15, %v92_v30  }
  0x98   :  { %v99_v31 = vld [vmem:[#allocation0] sm:$0x1] }
  0x99   :  { %102 = vst [vmem:[%s210_s1] sm:$0x1] %v99_v31 }

// kernel: basic_block_forward.1
= control target key start
LH: loop header
LB: loop body
LE: loop exit
PB: predicated region body
PF: predicated region fallthrough
CT: control target
= control target key end

     0   :  { %s1356_s18 = smov 0   ;;  %s1712_s0 = inlined_call_operand.vmem [shape: f32[2,16,128], index: 0, kind: input, shape index: {}]   ;;  %s1713_s1 = inlined_call_operand.vmem [shape: f32[3,128,128], index: 1, kind: input, shape index: {}]   ;;  %s1714_s2 = inlined_call_operand.vmem [shape: f32[1,128], index: 2, kind: input, shape index: {}]   ;;  %s1715_s3 = inlined_call_operand.vmem [shape: f32[3,128,128], index: 3, kind: input, shape index: {}]   ;;  %s1716_s4 = inlined_call_operand.vmem [shape: f32[1,128], index: 4, kind: input, shape index: {}]   ;;  %s1717_s5 = inlined_call_operand.vmem [shape: f32[2,16,128], index: 5, kind: output, shape index: {}]  }
   0x1 LB: > { %s911_s19 = sadd.s32 4294967295, %s1323_s18   ;;  %p915_p0 = scmp.ge.s32.totalorder %s1323_s18, 1  ;;  %s1323_s18 = sphi %s1356_s18, %s15_s18  }
   0x2   : > { %p187_p1 = scmp.lt.s32.totalorder %s1323_s18, 3 }
   0x4   : > { %p188_p2 = pnand %p915_p0, %p187_p1 }
   0x5   : > { %p215_p3 = scmp.lt.s32.totalorder (!%p188_p2), %s911_s19, 1 }
   0x6   : > { %191 = sbr.rel (%p188_p2) target bundleno = 527 (0x20f), region = 40 }
   0xb   : > { %v935_v0 = vld [vmem:[%s1713_s1 + $0xf8] sm:$0xff]  ;;  %v934_v2 = vld [vmem:[%s1713_s1 + $0xf0] sm:$0xff]  ;;  %v1325_v4 = vmov 0.0   ;;  %v933_v5 = vld [vmem:[%s1713_s1 + $0xe8] sm:$0xff]  ;;  %s1719_s19 = smov (!%p215_p3, %s911_s19), 1  ;;  %vm271_vm0 = vcmask 1046528  }
   0xc   : > { %v250_v1 = vld [vmem:[%s1713_s1 + $0x78] sm:$0xff]  ;;  %1098 = vmatprep.subr.mxu0 %v935_v0  ;;  %v249_v3 = vld [vmem:[%s1713_s1 + $0x70] sm:$0xff]  ;;  %227 = vst [vmem:[#allocation2] sm:$0xff] %v1325_v4  ;;  %228 = vst [vmem:[#allocation2 + $0x8] sm:$0xff] %v1325_v4  ;;  %s988_s11 = sshll.u32 %s1719_s19, 4  ;;  %vm446_vm1 = vcmask 1045504  }
   0xd   : > { %1133 = vmatprep.subr.mxu1 %v250_v1  ;;  %229 = vst [vmem:[#allocation2 + $0x10] sm:$0x3] %v1325_v4  ;;  %1099 = vmatpush3.msra.mxu0 %v935_v0  ;;  %v248_v6 = vld [vmem:[%s1713_s1 + $0x68] sm:$0xff]  ;;  %v932_v7 = vld [vmem:[%s1713_s1 + $0xe0] sm:$0xff]  ;;  %v931_v9 = vld [vmem:[%s1713_s1 + $0xd8] sm:$0xff]  ;;  %s219_s20 = scalar_lea.vmem %s1712_s0, %s988_s11  ;;  %s224_s23 = scalar_lea.vmem %s1717_s5, %s988_s11 }
   0xe   : > { %1134 = vmatpush3.msra.mxu1 %v250_v1  ;;  %1100 = vmatprep.subr.mxu0 %v934_v2  ;;  %v247_v8 = vld [vmem:[%s1713_s1 + $0x60] sm:$0xff]  ;;  %v246_v10 = vld [vmem:[%s1713_s1 + $0x58] sm:$0xff]  ;;  %v930_v11 = vld [vmem:[%s1713_s1 + $0xd0] sm:$0xff] }
   0xf   : > { %1135 = vmatprep.subr.mxu1 %v249_v3  ;;  %1101 = vmatpush3.msra.mxu0 %v934_v2  ;;  %v245_v12 = vld [vmem:[%s1713_s1 + $0x50] sm:$0xff]  ;;  %v929_v13 = vld [vmem:[%s1713_s1 + $0xc8] sm:$0xff]  ;;  %v1414_v15 = vld [vmem:[%s219_s20] sm:$0xff] }
  0x10   : > { %1136 = vmatpush3.msra.mxu1 %v249_v3  ;;  %1102 = vmatprep.subr.mxu0 %v933_v5  ;;  %v244_v14 = vld [vmem:[%s1713_s1 + $0x48] sm:$0xff]  ;;  %230 = vst [vmem:[#allocation2 + $0x1] sm:$0xff] %v1414_v15  ;;  %v928_v17 = vld [vmem:[%s1713_s1 + $0xc0] sm:$0xff]  ;;  %v927_v19 = vld [vmem:[%s1713_s1 + $0xb8] sm:$0xff] }
  0x11   : > { %1137 = vmatprep.subr.mxu1 %v248_v6  ;;  %1103 = vmatpush3.msra.mxu0 %v933_v5  ;;  %v1416_v16 = vld [vmem:[%s219_s20 + $0x8] sm:$0xff]  ;;  %v243_v18 = vld [vmem:[%s1713_s1 + $0x40] sm:$0xff]  ;;  %v242_v20 = vld [vmem:[%s1713_s1 + $0x38] sm:$0xff] }
  0x12   : > { %1138 = vmatpush3.msra.mxu1 %v248_v6  ;;  %1104 = vmatprep.subr.mxu0 %v932_v7  ;;  %231 = vst [vmem:[#allocation2 + $0x9] sm:$0xff] %v1416_v16  ;;  %v926_v21 = vld [vmem:[%s1713_s1 + $0xb0] sm:$0xff]  ;;  %v925_v23 = vld [vmem:[%s1713_s1 + $0xa8] sm:$0xff]  ;;  %v924_v25 = vld [vmem:[%s1713_s1 + $0xa0] sm:$0xff] }
  0x13   : > { %1139 = vmatprep.subr.mxu1 %v247_v8  ;;  %1105 = vmatpush3.msra.mxu0 %v932_v7  ;;  %v241_v22 = vld [vmem:[%s1713_s1 + $0x30] sm:$0xff]  ;;  %v240_v24 = vld [vmem:[%s1713_s1 + $0x28] sm:$0xff]  ;;  %v239_v26 = vld [vmem:[%s1713_s1 + $0x20] sm:$0xff] }
  0x14   : > { %1140 = vmatpush3.msra.mxu1 %v247_v8  ;;  %1106 = vmatprep.subr.mxu0 %v931_v9  ;;  %v923_v27 = vld [vmem:[%s1713_s1 + $0x98] sm:$0xff]  ;;  %v922_v31 = vld [vmem:[%s1713_s1 + $0x90] sm:$0xff]  ;;  %v921_v36 = vld [vmem:[%s1713_s1 + $0x88] sm:$0xff] }
  0x15   : > { %1141 = vmatprep.subr.mxu1 %v246_v10  ;;  %1107 = vmatpush3.msra.mxu0 %v931_v9  ;;  %v238_v28 = vld [vmem:[%s1713_s1 + $0x18] sm:$0xff]  ;;  %v237_v32 = vld [vmem:[%s1713_s1 + $0x10] sm:$0xff]  ;;  %v236_v37 = vld [vmem:[%s1713_s1 + $0x8] sm:$0xff] }
  0x16   : > { %1142 = vmatpush3.msra.mxu1 %v246_v10  ;;  %1108 = vmatprep.subr.mxu0 %v930_v11  ;;  %v920_v39 = vld [vmem:[%s1713_s1 + $0x80] sm:$0xff]  ;;  %v951_v45 = vld [vmem:[%s1713_s1 + $0x178] sm:$0xff]  ;;  %v950_v47 = vld [vmem:[%s1713_s1 + $0x170] sm:$0xff] }
  0x17   : > { %1143 = vmatprep.subr.mxu1 %v245_v12  ;;  %1109 = vmatpush3.msra.mxu0 %v930_v11  ;;  %v232_v29 = vld [vmem:[#allocation2] sm:$0xff]  ;;  %v949_v48 = vld [vmem:[%s1713_s1 + $0x168] sm:$0xff]  ;;  %v947_v50 = vld [vmem:[%s1713_s1 + $0x158] sm:$0xff] }
  0x18   : > { %1144 = vmatpush3.msra.mxu1 %v245_v12  ;;  %1110 = vmatprep.subr.mxu0 %v929_v13  ;;  %v272_v34 = vrot.slane %v232_v29, 1  ;;  %v235_v40 = vld [vmem:[%s1713_s1] sm:$0xff]  ;;  %v447_v41 = vrot.slane %v232_v29, 2  ;;  %v946_v51 = vld [vmem:[%s1713_s1 + $0x150] sm:$0xff]  ;;  %v945_v52 = vld [vmem:[%s1713_s1 + $0x148] sm:$0xff] }
  0x19   : > { %1145 = vmatprep.subr.mxu1 %v244_v14  ;;  %1111 = vmatpush3.msra.mxu0 %v929_v13  ;;  %v1456_v30 = vld [vmem:[#allocation2 + $0x8] sm:$0xff]  ;;  %v1464_v33 = vld [vmem:[#allocation2 + $0x10] sm:$0x3]  ;;  %v948_v49 = vld [vmem:[%s1713_s1 + $0x160] sm:$0xff] }
  0x1a   : > { %1146 = vmatpush3.msra.mxu1 %v244_v14  ;;  %1112 = vmatprep.subr.mxu0 %v928_v17  ;;  %v273_v35 = vrot.slane %v1456_v30, 1  ;;  %v275_v38 = vrot.slane %v1464_v33, 1  ;;  %v448_v42 = vrot.slane %v1456_v30, 2  ;;  %v944_v53 = vld [vmem:[%s1713_s1 + $0x140] sm:$0xff]  ;;  %v943_v54 = vld [vmem:[%s1713_s1 + $0x138] sm:$0xff]  ;;  %v942_v55 = vld [vmem:[%s1713_s1 + $0x130] sm:$0xff] }
  0x1b   : > { %1147 = vmatprep.subr.mxu1 %v243_v18  ;;  %1113 = vmatpush3.msra.mxu0 %v928_v17  ;;  %v941_v56 = vld [vmem:[%s1713_s1 + $0x128] sm:$0xff]  ;;  %v940_v57 = vld [vmem:[%s1713_s1 + $0x120] sm:$0xff]  ;;  %v939_v58 = vld [vmem:[%s1713_s1 + $0x118] sm:$0xff]  ;;  %v450_v61 = vrot.slane %v1464_v33, 2 }
  0x1c   : > { %1148 = vmatpush3.msra.mxu1 %v243_v18  ;;  %1114 = vmatprep.subr.mxu0 %v927_v19  ;;  %v274_v43 = vsel %vm271_vm0, %v272_v34, %v273_v35  ;;  %v276_v44 = vsel %vm271_vm0, %v273_v35, %v275_v38  ;;  %v449_v46 = vsel %vm446_vm1, %v447_v41, %v448_v42  ;;  %v938_v59 = vld [vmem:[%s1713_s1 + $0x110] sm:$0xff]  ;;  %v937_v60 = vld [vmem:[%s1713_s1 + $0x108] sm:$0xff]  ;;  %v936_v62 = vld [vmem:[%s1713_s1 + $0x100] sm:$0xff] }
  0x1d   : > { %1149 = vmatprep.subr.mxu1 %v242_v20  ;;  %1115 = vmatpush3.msra.mxu0 %v927_v19  ;;  %v451_v63 = vsel %vm446_vm1, %v448_v42, %v450_v61  ;;  %v562_v0 = vld [vmem:[%s1715_s3 + $0x78] sm:$0xff]  ;;  %v561_v2 = vld [vmem:[%s1715_s3 + $0x70] sm:$0xff]  ;;  %v560_v4 = vld [vmem:[%s1715_s3 + $0x68] sm:$0xff] }
  0x1e   : > { %1150 = vmatpush3.msra.mxu1 %v242_v20  ;;  %1116 = vmatprep.subr.mxu0 %v926_v21  ;;  %v968_v1 = vld [vmem:[%s1715_s3 + $0xf8] sm:$0xff]  ;;  %v967_v3 = vld [vmem:[%s1715_s3 + $0xf0] sm:$0xff]  ;;  %v966_v5 = vld [vmem:[%s1715_s3 + $0xe8] sm:$0xff] }
  0x1f   : > { %1151 = vmatprep.subr.mxu1 %v241_v22  ;;  %1117 = vmatpush3.msra.mxu0 %v926_v21  ;;  %v559_v6 = vld [vmem:[%s1715_s3 + $0x60] sm:$0xff]  ;;  %v558_v8 = vld [vmem:[%s1715_s3 + $0x58] sm:$0xff]  ;;  %v557_v10 = vld [vmem:[%s1715_s3 + $0x50] sm:$0xff] }
  0x20   : > { %1152 = vmatpush3.msra.mxu1 %v241_v22  ;;  %1118 = vmatprep.subr.mxu0 %v925_v23  ;;  %v965_v7 = vld [vmem:[%s1715_s3 + $0xe0] sm:$0xff]  ;;  %v964_v9 = vld [vmem:[%s1715_s3 + $0xd8] sm:$0xff]  ;;  %v963_v11 = vld [vmem:[%s1715_s3 + $0xd0] sm:$0xff] }
  0x21   : > { %1153 = vmatprep.subr.mxu1 %v240_v24  ;;  %1119 = vmatpush3.msra.mxu0 %v925_v23  ;;  %v556_v12 = vld [vmem:[%s1715_s3 + $0x48] sm:$0xff]  ;;  %v555_v14 = vld [vmem:[%s1715_s3 + $0x40] sm:$0xff]  ;;  %v554_v18 = vld [vmem:[%s1715_s3 + $0x38] sm:$0xff] }
  0x22   : > { %1154 = vmatpush3.msra.mxu1 %v240_v24  ;;  %1120 = vmatprep.subr.mxu0 %v924_v25  ;;  %v962_v13 = vld [vmem:[%s1715_s3 + $0xc8] sm:$0xff]  ;;  %v961_v17 = vld [vmem:[%s1715_s3 + $0xc0] sm:$0xff]  ;;  %v960_v19 = vld [vmem:[%s1715_s3 + $0xb8] sm:$0xff] }
  0x23   : > { %1155 = vmatprep.subr.mxu1 %v239_v26  ;;  %1121 = vmatpush3.msra.mxu0 %v924_v25  ;;  %v553_v20 = vld [vmem:[%s1715_s3 + $0x30] sm:$0xff]  ;;  %v552_v22 = vld [vmem:[%s1715_s3 + $0x28] sm:$0xff]  ;;  %v551_v24 = vld [vmem:[%s1715_s3 + $0x20] sm:$0xff] }
  0x24   : > { %1156 = vmatpush3.msra.mxu1 %v239_v26  ;;  %1122 = vmatprep.subr.mxu0 %v923_v27  ;;  %v959_v21 = vld [vmem:[%s1715_s3 + $0xb0] sm:$0xff]  ;;  %v958_v23 = vld [vmem:[%s1715_s3 + $0xa8] sm:$0xff]  ;;  %v957_v25 = vld [vmem:[%s1715_s3 + $0xa0] sm:$0xff] }
  0x25   : > { %1157 = vmatprep.subr.mxu1 %v238_v28  ;;  %1123 = vmatpush3.msra.mxu0 %v923_v27  ;;  %v550_v26 = vld [vmem:[%s1715_s3 + $0x18] sm:$0xff]  ;;  %v953_v33 = vld [vmem:[%s1715_s3 + $0x80] sm:$0xff] }
  0x26   : > { %1158 = vmatpush3.msra.mxu1 %v238_v28  ;;  %1124 = vmatprep.subr.mxu0 %v922_v31  ;;  %v956_v27 = vld [vmem:[%s1715_s3 + $0x98] sm:$0xff]  ;;  %v549_v28 = vld [vmem:[%s1715_s3 + $0x10] sm:$0xff]  ;;  %v952_v41 = vld [vmem:[%s1714_s2] ss:$0 sm:$0xff] }
  0x27   : > { %1159 = vmatprep.subr.mxu1 %v237_v32  ;;  %1125 = vmatpush3.msra.mxu0 %v922_v31  ;;  %v954_v31 = vld [vmem:[%s1715_s3 + $0x88] sm:$0xff]  ;;  %v984_v34 = vld [vmem:[%s1715_s3 + $0x178] sm:$0xff] }
  0x28   : > { %1160 = vmatpush3.msra.mxu1 %v237_v32  ;;  %1126 = vmatprep.subr.mxu0 %v921_v36  ;;  %v547_v32 = vld [vmem:[%s1715_s3] sm:$0xff] }
  0x29   : > { %1161 = vmatprep.subr.mxu1 %v236_v37  ;;  %1127 = vmatpush3.msra.mxu0 %v921_v36 }
  0x2a   : > { %1162 = vmatpush3.msra.mxu1 %v236_v37  ;;  %1128 = vmatprep.subr.mxu0 %v920_v39 }
  0x2b   : > { %1163 = vmatprep.subr.mxu1 %v235_v40  ;;  %1129 = vmatpush3.msra.mxu0 %v920_v39 }
  0x2c   : > { %1130 = vmatprep.mubr.f32.mxu0 %v274_v43  ;;  %1164 = vmatpush3.msra.mxu1 %v235_v40 }
  0x2d   : > { %1165 = vmatprep.mubr.f32.mxu1 %v232_v29  ;;  %1131 = vmatmul.mubr.f32.vlgmr.msra.gmra.mxu0 %v276_v44  ;;  %v955_v29 = vld [vmem:[%s1715_s3 + $0x90] sm:$0xff] }
  0x2e   : > { %1166 = vmatmul.mubr.f32.vlgmr.msra.gmra.mxu1 %v1456_v30  ;;  %1168 = vmatprep.subr.mxu0 %v951_v45  ;;  %v548_v30 = vld [vmem:[%s1715_s3 + $0x8] sm:$0xff] }
  0x2f   : > { %1200 = vmatprep.mubr.f32.mxu0 %v449_v46  ;;  %1169 = vmatpush3.msra.mxu0 %v951_v45 }
  0x30   : > { %1170 = vmatprep.subr.mxu0 %v950_v47  ;;  %1203 = vmatprep.subr.mxu1 %v968_v1 }
  0x31   : > { %1171 = vmatpush3.msra.mxu0 %v950_v47  ;;  %1204 = vmatpush3.msra.mxu1 %v968_v1  ;;  %v979_v1 = vld [vmem:[%s1715_s3 + $0x150] sm:$0xff] }
  0x32   : > { %1172 = vmatprep.subr.mxu0 %v949_v48  ;;  %1205 = vmatprep.subr.mxu1 %v967_v3 }
  0x33   : > { %1173 = vmatpush3.msra.mxu0 %v949_v48  ;;  %1206 = vmatpush3.msra.mxu1 %v967_v3  ;;  %v977_v3 = vld [vmem:[%s1715_s3 + $0x140] sm:$0xff] }
  0x34   : > { %1174 = vmatprep.subr.mxu0 %v948_v49  ;;  %1207 = vmatprep.subr.mxu1 %v966_v5 }
  0x35   : > { %1175 = vmatpush3.msra.mxu0 %v948_v49  ;;  %1208 = vmatpush3.msra.mxu1 %v966_v5  ;;  %v975_v5 = vld [vmem:[%s1715_s3 + $0x130] sm:$0xff] }
  0x36   : > { %1176 = vmatprep.subr.mxu0 %v947_v50  ;;  %1209 = vmatprep.subr.mxu1 %v965_v7 }
  0x37   : > { %1177 = vmatpush3.msra.mxu0 %v947_v50  ;;  %1210 = vmatpush3.msra.mxu1 %v965_v7  ;;  %v973_v7 = vld [vmem:[%s1715_s3 + $0x120] sm:$0xff] }
  0x38   : > { %1178 = vmatprep.subr.mxu0 %v946_v51  ;;  %1211 = vmatprep.subr.mxu1 %v964_v9 }
  0x39   : > { %1179 = vmatpush3.msra.mxu0 %v946_v51  ;;  %1212 = vmatpush3.msra.mxu1 %v964_v9  ;;  %v971_v9 = vld [vmem:[%s1715_s3 + $0x110] sm:$0xff] }
  0x3a   : > { %1180 = vmatprep.subr.mxu0 %v945_v52  ;;  %1213 = vmatprep.subr.mxu1 %v963_v11 }
  0x3b   : > { %1181 = vmatpush3.msra.mxu0 %v945_v52  ;;  %1214 = vmatpush3.msra.mxu1 %v963_v11  ;;  %v969_v11 = vld [vmem:[%s1715_s3 + $0x100] sm:$0xff] }
  0x3c   : > { %1182 = vmatprep.subr.mxu0 %v944_v53  ;;  %1215 = vmatprep.subr.mxu1 %v962_v13 }
  0x3d   : > { %1183 = vmatpush3.msra.mxu0 %v944_v53  ;;  %1216 = vmatpush3.msra.mxu1 %v962_v13 }
  0x3e   : > { %1184 = vmatprep.subr.mxu0 %v943_v54  ;;  %1217 = vmatprep.subr.mxu1 %v961_v17 }
  0x3f   : > { %1185 = vmatpush3.msra.mxu0 %v943_v54  ;;  %1218 = vmatpush3.msra.mxu1 %v961_v17 }
  0x40   : > { %1186 = vmatprep.subr.mxu0 %v942_v55  ;;  %1219 = vmatprep.subr.mxu1 %v960_v19 }
  0x41   : > { %1187 = vmatpush3.msra.mxu0 %v942_v55  ;;  %1220 = vmatpush3.msra.mxu1 %v960_v19 }
  0x42   : > { %1188 = vmatprep.subr.mxu0 %v941_v56  ;;  %1221 = vmatprep.subr.mxu1 %v959_v21 }
  0x43   : > { %1189 = vmatpush3.msra.mxu0 %v941_v56  ;;  %1222 = vmatpush3.msra.mxu1 %v959_v21 }
  0x44   : > { %1190 = vmatprep.subr.mxu0 %v940_v57  ;;  %1223 = vmatprep.subr.mxu1 %v958_v23 }
  0x45   : > { %1191 = vmatpush3.msra.mxu0 %v940_v57  ;;  %1224 = vmatpush3.msra.mxu1 %v958_v23 }
  0x46   : > { %1192 = vmatprep.subr.mxu0 %v939_v58  ;;  %1225 = vmatprep.subr.mxu1 %v957_v25 }
  0x47   : > { %1193 = vmatpush3.msra.mxu0 %v939_v58  ;;  %1226 = vmatpush3.msra.mxu1 %v957_v25 }
  0x48   : > { %1194 = vmatprep.subr.mxu0 %v938_v59  ;;  %1227 = vmatprep.subr.mxu1 %v956_v27 }
  0x49   : > { %1195 = vmatpush3.msra.mxu0 %v938_v59  ;;  %1228 = vmatpush3.msra.mxu1 %v956_v27 }
  0x4a   : > { %1196 = vmatprep.subr.mxu0 %v937_v60  ;;  %1229 = vmatprep.subr.mxu1 %v955_v29 }
  0x4b   : > { %1197 = vmatpush3.msra.mxu0 %v937_v60  ;;  %1230 = vmatpush3.msra.mxu1 %v955_v29  ;;  %v983_v60 = vld [vmem:[%s1715_s3 + $0x170] sm:$0xff] }
  0x4c   : > { %1198 = vmatprep.subr.mxu0 %v936_v62  ;;  %1231 = vmatprep.subr.mxu1 %v954_v31 }
  0x4d   : > { %1199 = vmatpush3.msra.mxu0 %v936_v62  ;;  %1232 = vmatpush3.msra.mxu1 %v954_v31  ;;  %v982_v62 = vld [vmem:[%s1715_s3 + $0x168] sm:$0xff] }
  0x4e   : > { %1201 = vmatmul.mubr.f32.vlgmr.msra.gmra.mxu0 %v451_v63  ;;  %1238 = vmatprep.subr.mxu0 %v562_v0  ;;  %v981_v63 = vld [vmem:[%s1715_s3 + $0x160] sm:$0xff] }
  0x4f   : > { %1239 = vmatpush3.msra.mxu0 %v562_v0  ;;  %1233 = vmatprep.subr.mxu1 %v953_v33  ;;  %v980_v0 = vld [vmem:[%s1715_s3 + $0x158] sm:$0xff] }
  0x50   : > { %1240 = vmatprep.subr.mxu0 %v561_v2  ;;  %1234 = vmatpush3.msra.mxu1 %v953_v33 }
  0x51   : > { %1241 = vmatpush3.msra.mxu0 %v561_v2  ;;  %1273 = vmatprep.subr.mxu1 %v984_v34  ;;  %v978_v2 = vld [vmem:[%s1715_s3 + $0x148] sm:$0xff] }
  0x52   : > { %1242 = vmatprep.subr.mxu0 %v560_v4 }
  0x53   : > { %1243 = vmatpush3.msra.mxu0 %v560_v4  ;;  %v976_v4 = vld [vmem:[%s1715_s3 + $0x138] sm:$0xff] }
  0x54   : > { %1244 = vmatprep.subr.mxu0 %v559_v6 }
  0x55   : > { %1245 = vmatpush3.msra.mxu0 %v559_v6  ;;  %v974_v6 = vld [vmem:[%s1715_s3 + $0x128] sm:$0xff] }
  0x56   : > { %1246 = vmatprep.subr.mxu0 %v558_v8 }
  0x57   : > { %1247 = vmatpush3.msra.mxu0 %v558_v8  ;;  %v972_v8 = vld [vmem:[%s1715_s3 + $0x118] sm:$0xff] }
  0x58   : > { %1248 = vmatprep.subr.mxu0 %v557_v10 }
  0x59   : > { %1249 = vmatpush3.msra.mxu0 %v557_v10  ;;  %v970_v10 = vld [vmem:[%s1715_s3 + $0x108] sm:$0xff] }
  0x5a   : > { %1250 = vmatprep.subr.mxu0 %v556_v12 }
  0x5b   : > { %1251 = vmatpush3.msra.mxu0 %v556_v12 }
  0x5c   : > { %1252 = vmatprep.subr.mxu0 %v555_v14 }
  0x5d   : > { %1253 = vmatpush3.msra.mxu0 %v555_v14 }
  0x5e   : > { %1254 = vmatprep.subr.mxu0 %v554_v18 }
  0x5f   : > { %1255 = vmatpush3.msra.mxu0 %v554_v18 }
  0x60   : > { %1256 = vmatprep.subr.mxu0 %v553_v20 }
  0x61   : > { %1257 = vmatpush3.msra.mxu0 %v553_v20 }
  0x62   : > { %1258 = vmatprep.subr.mxu0 %v552_v22 }
  0x63   : > { %1259 = vmatpush3.msra.mxu0 %v552_v22  ;;  %v985_v22 = vld [vmem:[%s1716_s4] ss:$0 sm:$0xff] }
  0x64   : > { %1260 = vmatprep.subr.mxu0 %v551_v24 }
  0x65   : > { %1261 = vmatpush3.msra.mxu0 %v551_v24 }
  0x66   : > { %1262 = vmatprep.subr.mxu0 %v550_v26 }
  0x67   : > { %1263 = vmatpush3.msra.mxu0 %v550_v26 }
  0x68   : > { %1264 = vmatprep.subr.mxu0 %v549_v28 }
  0x69   : > { %1265 = vmatpush3.msra.mxu0 %v549_v28 }
  0x6a   : > { %1266 = vmatprep.subr.mxu0 %v548_v30 }
  0x6b   : > { %1267 = vmatpush3.msra.mxu0 %v548_v30 }
  0x6c   : > { %1268 = vmatprep.subr.mxu0 %v547_v32 }
  0x6d   : > { %1269 = vmatpush3.msra.mxu0 %v547_v32 }
  0xed   : > { %v1132_v35 = vpop.f32.mrf.mxu0 }
  0xee   : > { %v1167_v36 = vpop.f32.mrf.mxu1 }
  0xef   : > { %v345_v37 = vpop.f32.mrf.mxu0  ;;  %v426_v39 = vadd.f32 %v1167_v36, %v1132_v35 }
  0xf0   : > { %v420_v38 = vpop.f32.mrf.mxu1 }
  0xf1   : > { %v421_v42 = vadd.f32 %v420_v38, %v345_v37 }
 0x10e   : > { %v1202_v40 = vpop.f32.mrf.mxu0 }
 0x10f   : > { %v530_v43 = vadd.f32 %v1202_v40, %v426_v39 }
 0x110   : > { %v520_v44 = vpop.f32.mrf.mxu0 }
 0x111   : > { %v539_v45 = vadd.f32 %v952_v41, %v530_v43  ;;  %v529_v46 = vadd.f32 %v520_v44, %v421_v42 }
 0x113   : > { %v541_v47 = vmax.f32 %v539_v45, 0.0  ;;  %v538_v48 = vadd.f32 %v952_v41, %v529_v46 }
 0x115   : > { %543 = vst [vmem:[#allocation2 + $0x9] sm:$0xff] %v541_v47  ;;  %v540_v49 = vmax.f32 %v538_v48, 0.0 }
 0x117   : > { %542 = vst [vmem:[#allocation2 + $0x1] sm:$0xff] %v540_v49 }
 0x11c   : > { %v1641_v50 = vld [vmem:[#allocation2 + $0x10] sm:$0x3] }
 0x11d   : > { %v586_v53 = vrot.slane %v1641_v50, 1  ;;  %v760_v12 = vrot.slane %v1641_v50, 2 }
 0x11e   : > { %v544_v51 = vld [vmem:[#allocation2] sm:$0xff]  ;;  %v1643_v52 = vld [vmem:[#allocation2 + $0x8] sm:$0xff] }
 0x11f   : > { %v583_v54 = vrot.slane %v544_v51, 1  ;;  %1270 = vmatprep.mubr.f32.mxu0 %v544_v51  ;;  %v757_v55 = vrot.slane %v544_v51, 2  ;;  %v584_v56 = vrot.slane %v1643_v52, 1  ;;  %v758_v57 = vrot.slane %v1643_v52, 2 }
 0x120   : > { %1271 = vmatmul.mubr.f32.vlgmr.msra.gmra.mxu0 %v1643_v52 }
 0x121   : > { %v585_v58 = vsel %vm271_vm0, %v583_v54, %v584_v56  ;;  %v587_v59 = vsel %vm271_vm0, %v584_v56, %v586_v53  ;;  %v759_v61 = vsel %vm446_vm1, %v757_v55, %v758_v57  ;;  %v761_v13 = vsel %vm446_vm1, %v758_v57, %v760_v12 }
 0x122   : > { %1235 = vmatprep.mubr.f32.mxu1 %v585_v58 }
 0x123   : > { %1236 = vmatmul.mubr.f32.vlgmr.msra.gmra.mxu1 %v587_v59 }
 0x124   : > { %1274 = vmatpush3.msra.mxu1 %v984_v34  ;;  %1305 = vmatprep.mubr.f32.mxu1 %v759_v61 }
 0x125   : > { %1275 = vmatprep.subr.mxu1 %v983_v60 }
 0x126   : > { %1276 = vmatpush3.msra.mxu1 %v983_v60 }
 0x127   : > { %1277 = vmatprep.subr.mxu1 %v982_v62 }
 0x128   : > { %1278 = vmatpush3.msra.mxu1 %v982_v62 }
 0x129   : > { %1279 = vmatprep.subr.mxu1 %v981_v63 }
 0x12a   : > { %1280 = vmatpush3.msra.mxu1 %v981_v63 }
 0x12b   : > { %1281 = vmatprep.subr.mxu1 %v980_v0 }
 0x12c   : > { %1282 = vmatpush3.msra.mxu1 %v980_v0 }
 0x12d   : > { %1283 = vmatprep.subr.mxu1 %v979_v1 }
 0x12e   : > { %1284 = vmatpush3.msra.mxu1 %v979_v1 }
 0x12f   : > { %1285 = vmatprep.subr.mxu1 %v978_v2 }
 0x130   : > { %1286 = vmatpush3.msra.mxu1 %v978_v2 }
 0x131   : > { %1287 = vmatprep.subr.mxu1 %v977_v3 }
 0x132   : > { %1288 = vmatpush3.msra.mxu1 %v977_v3 }
 0x133   : > { %1289 = vmatprep.subr.mxu1 %v976_v4 }
 0x134   : > { %1290 = vmatpush3.msra.mxu1 %v976_v4 }
 0x135   : > { %1291 = vmatprep.subr.mxu1 %v975_v5 }
 0x136   : > { %1292 = vmatpush3.msra.mxu1 %v975_v5 }
 0x137   : > { %1293 = vmatprep.subr.mxu1 %v974_v6 }
 0x138   : > { %1294 = vmatpush3.msra.mxu1 %v974_v6 }
 0x139   : > { %1295 = vmatprep.subr.mxu1 %v973_v7 }
 0x13a   : > { %1296 = vmatpush3.msra.mxu1 %v973_v7 }
 0x13b   : > { %1297 = vmatprep.subr.mxu1 %v972_v8 }
 0x13c   : > { %1298 = vmatpush3.msra.mxu1 %v972_v8 }
 0x13d   : > { %1299 = vmatprep.subr.mxu1 %v971_v9 }
 0x13e   : > { %1300 = vmatpush3.msra.mxu1 %v971_v9 }
 0x13f   : > { %1301 = vmatprep.subr.mxu1 %v970_v10 }
 0x140   : > { %1302 = vmatpush3.msra.mxu1 %v970_v10 }
 0x141   : > { %1303 = vmatprep.subr.mxu1 %v969_v11 }
 0x142   : > { %1304 = vmatpush3.msra.mxu1 %v969_v11 }
 0x143   : > { %1306 = vmatmul.mubr.f32.vlgmr.msra.gmra.mxu1 %v761_v13 }
 0x1e0   : > { %v1272_v17 = vpop.f32.mrf.mxu0 }
 0x1e2   : > { %v731_v20 = vpop.f32.mrf.mxu0 }
 0x1e3   : > { %v1237_v14 = vpop.f32.mrf.mxu1 }
 0x1e4   : > { %v737_v19 = vadd.f32 %v1272_v17, %v1237_v14 }
 0x1e5   : > { %v656_v18 = vpop.f32.mrf.mxu1 }
 0x1e6   : > { %v732_v23 = vadd.f32 %v731_v20, %v656_v18 }
 0x203   : > { %v1307_v21 = vpop.f32.mrf.mxu1 }
 0x204   : > { %v840_v24 = vadd.f32 %v1307_v21, %v737_v19 }
 0x205   : > { %v830_v25 = vpop.f32.mrf.mxu1 }
 0x206   : > { %v849_v26 = vadd.f32 %v985_v22, %v840_v24  ;;  %v839_v27 = vadd.f32 %v830_v25, %v732_v23 }
 0x208   : > { %v851_v28 = vadd.f32 %v849_v26, %v1416_v16  ;;  %v848_v29 = vadd.f32 %v985_v22, %v839_v27 }
 0x20a   : > { %v853_v30 = vmax.f32 %v851_v28, 0.0  ;;  %v850_v31 = vadd.f32 %v848_v29, %v1414_v15 }
 0x20c   : > { %855 = vst [vmem:[%s224_s23 + $0x8] sm:$0xff] %v853_v30  ;;  %v852_v32 = vmax.f32 %v850_v31, 0.0 }
 0x20e   : > { %854 = vst [vmem:[%s224_s23] sm:$0xff] %v852_v32 }
 0x20f PF: > { %s15_s18 = sadd.s32 1, %s1323_s18  }
 0x210   : > { %p12_p4 = scmp.ge.s32.totalorder %s15_s18, 4  }
 0x212   :  { %14 = sbr.rel (!%p12_p4) target bundleno = 1 (0x1), region = 74 }

</bundles_post_ra>
